<compile_context>
chip_gen: v6e
topology: v6e:2x2x1
jax: 0.10.0
libtpu: 0.0.40
codegen_flags: <defaults>
</compile_context>

<pallas_src>
import functools

import jax
import jax.numpy as jnp
from jax import lax
from jax.experimental import pallas as pl
from jax.experimental.pallas import tpu as pltpu


# ----------------------------------------------------------------------------
# Tiling selection (shared by weight packing and the forward pass)
# ----------------------------------------------------------------------------

def _tiling(Mt, Co, block_m=512, tile_co=16):
    """Pick (block_m, padded mode extent Mp, tile_co)."""
    # Co tile: must be a multiple of 8 (sublane constraint) dividing Co,
    # otherwise fall back to the full Co extent.
    if Co % 8 == 0:
        tco = max(8, min((tile_co // 8) * 8, Co))
        while Co % tco:
            tco -= 8
    else:
        tco = Co
    n_co = Co // tco

    # Lane block: multiple of 128 dividing the 128-padded mode extent.
    Mp = max(128, ((Mt + 127) // 128) * 128)
    bm = max(128, (min(block_m, Mp) // 128) * 128)
    if n_co < 2 and Mp >= 256:
        # Guarantee >= 2 grid blocks (megacore sharding + DMA/compute overlap).
        bm = min(bm, max(128, (Mp // 2 // 128) * 128))
    while Mp % bm:
        bm -= 128
    return bm, Mp, tco


# ----------------------------------------------------------------------------
# Pallas kernel: per-mode complex channel contraction, lane-dense on modes
# ----------------------------------------------------------------------------

def _spec_mul_kernel(x_ref, w_ref, o_ref):
    """out[b, o, m] = sum_i x[b, i, m] * w[i, o, m]   (complex, re/im packed).

    Block shapes (last / lane dim = modes, multiple of 128):
      x : (2*Ci, B,   bm)   rows [0:Ci] real, [Ci:2Ci] imag
      w : (2*Ci, TCo, bm)   rows [0:Ci] real, [Ci:2Ci] imag
      o : (2*B,  TCo, bm)   rows [0:B]  real, [B:2B]   imag
    """
    two_ci, B, bm = x_ref.shape
    ci = two_ci // 2
    tco = w_ref.shape[1]

    # Keep the unrolled window of weight loads within ~half the vreg file.
    per_iter_vregs = max(1, (2 * tco * bm * 4) // 4096)
    unroll = max(1, min(8, ci, 32 // per_iter_vregs))

    for b in range(B):                              # static; B is small
        def body(i, carry):
            acc_r, acc_i = carry
            xr = x_ref[i, b:b + 1, :]               # (1, bm)
            xi = x_ref[ci + i, b:b + 1, :]
            wr = w_ref[i]                           # (tco, bm)
            wi = w_ref[ci + i]
            acc_r = acc_r + xr * wr - xi * wi
            acc_i = acc_i + xr * wi + xi * wr
            return acc_r, acc_i

        acc_r, acc_i = lax.fori_loop(
            0, ci, body,
            (jnp.zeros((tco, bm), jnp.float32),
             jnp.zeros((tco, bm), jnp.float32)),
            unroll=unroll)
        o_ref[b] = acc_r                            # each output tile written once
        o_ref[B + b] = acc_i


def spectral_mode_mul(x_pk, w_pk, bm, tco):
    """Lane-dense per-mode complex channel mixing.

    x_pk : (2*Ci, B,  Mp)  re/im-packed retained Fourier modes
    w_pk : (2*Ci, Co, Mp)  re/im-packed spectral weights (corner-major modes)
    returns (2*B, Co, Mp) re/im-packed mixed modes (float32)
    """
    two_ci, B, Mp = x_pk.shape
    Ci = two_ci // 2
    Co = w_pk.shape[1]
    n_m, n_co = Mp // bm, Co // tco

    # x is independent of the Co grid axis -> stays resident across it;
    # weights (dominant HBM stream) are read exactly once.
    x_spec = pl.BlockSpec((2 * Ci, B, bm), lambda m, c: (0, 0, m))
    w_spec = pl.BlockSpec((2 * Ci, tco, bm), lambda m, c: (0, c, m))
    o_spec = pl.BlockSpec((2 * B, tco, bm), lambda m, c: (0, c, m))

    # Double-buffered per-step VMEM requirement (+25% headroom).
    need = 2 * 4 * (2 * Ci * B * bm + 2 * Ci * tco * bm + 2 * B * tco * bm)
    vmem_limit = int(min(max(need + need // 4, 32 * 1024 * 1024),
                         128 * 1024 * 1024))

    flops = 8 * B * Ci * Co * Mp                    # complex MAC = 8 real flops
    bytes_accessed = 4 * (2 * Ci * B * Mp + 2 * Ci * Co * Mp + 2 * B * Co * Mp)

    return pl.pallas_call(
        _spec_mul_kernel,
        out_shape=jax.ShapeDtypeStruct((2 * B, Co, Mp), jnp.float32),
        grid=(n_m, n_co),
        in_specs=[x_spec, w_spec],
        out_specs=o_spec,
        compiler_params=pltpu.CompilerParams(
            dimension_semantics=("parallel", "parallel"),
            vmem_limit_bytes=vmem_limit),
        cost_estimate=pl.CostEstimate(
            flops=flops, transcendentals=0, bytes_accessed=bytes_accessed),
    )(x_pk, w_pk)


# ----------------------------------------------------------------------------
# Weight packing (done ONCE, outside the jitted hot path)
# ----------------------------------------------------------------------------

def pack_spectral_weights(wr, wi, block_m=512, tile_co=16):
    """(4, Ci, Co, m1, m2, m3) re/im -> (2*Ci, Co, Mp) corner-major, lane-padded."""
    _, Ci, Co, m1, m2, m3 = wr.shape
    M = m1 * m2 * m3
    Mt = 4 * M
    _, Mp, _ = _tiling(Mt, Co, block_m, tile_co)

    wr_f = jnp.transpose(wr.reshape(4, Ci, Co, M), (1, 2, 0, 3)).reshape(Ci, Co, Mt)
    wi_f = jnp.transpose(wi.reshape(4, Ci, Co, M), (1, 2, 0, 3)).reshape(Ci, Co, Mt)
    w_pk = jnp.concatenate([wr_f, wi_f], axis=0).astype(jnp.float32)
    if Mp > Mt:
        w_pk = jnp.pad(w_pk, ((0, 0), (0, 0), (0, Mp - Mt)))
    return w_pk


# ----------------------------------------------------------------------------
# SpectralConv3d forward (FFT in XLA, complex mode mixing in Pallas)
# ----------------------------------------------------------------------------

def spectral_conv3d(x, w_packed, modes):
    """Forward of SpectralConv3d.

    x        : (B, Ci, Sx, Sy, T) float32
    w_packed : (2*Ci, Co, Mp) float32 from pack_spectral_weights()
    modes    : (m1, m2, m3)
    returns  : (B, Co, Sx, Sy, T) float32
    """
    m1, m2, m3 = modes
    B, Ci, Sx, Sy, T = x.shape
    Co = w_packed.shape[1]
    M = m1 * m2 * m3
    Mt = 4 * M
    bm, Mp, tco = _tiling(Mt, Co)
    assert w_packed.shape == (2 * Ci, Co, Mp), (w_packed.shape, (2 * Ci, Co, Mp))

    # 3D real FFT over the last three axes (same convention/norm as torch).
    x_ft = jnp.fft.rfftn(x, axes=(-3, -2, -1))        # (B, Ci, Sx, Sy, T//2+1) c64

    # Gather the 4 retained corners, flatten modes corner-major onto the lane
    # axis, and pack re/im along the leading Ci axis -> (2*Ci, B, Mt).
    corners = [
        x_ft[:, :, :m1, :m2, :m3],
        x_ft[:, :, -m1:, :m2, :m3],
        x_ft[:, :, :m1, -m2:, :m3],
        x_ft[:, :, -m1:, -m2:, :m3],
    ]
    xc = jnp.concatenate([c.reshape(B, Ci, M) for c in corners], axis=-1)
    x_pk = jnp.concatenate(
        [jnp.transpose(jnp.real(xc), (1, 0, 2)),
         jnp.transpose(jnp.imag(xc), (1, 0, 2))], axis=0).astype(jnp.float32)
    if Mp > Mt:
        x_pk = jnp.pad(x_pk, ((0, 0), (0, 0), (0, Mp - Mt)))

    o_pk = spectral_mode_mul(x_pk, w_packed, bm, tco)  # (2*B, Co, Mp)

    oc = lax.complex(o_pk[:B, :, :Mt], o_pk[B:, :, :Mt])  # (B, Co, 4M)

    # Scatter the 4 mixed corners back into the zero-initialized spectrum
    # (sequential assignment; last write wins, same as the PyTorch slicing).
    Tr = T // 2 + 1
    out_ft = jnp.zeros((B, Co, Sx, Sy, Tr), dtype=jnp.complex64)
    blk = [oc[:, :, k * M:(k + 1) * M].reshape(B, Co, m1, m2, m3) for k in range(4)]
    out_ft = out_ft.at[:, :, :m1, :m2, :m3].set(blk[0])
    out_ft = out_ft.at[:, :, -m1:, :m2, :m3].set(blk[1])
    out_ft = out_ft.at[:, :, :m1, -m2:, :m3].set(blk[2])
    out_ft = out_ft.at[:, :, -m1:, -m2:, :m3].set(blk[3])

    return jnp.fft.irfftn(out_ft, s=(Sx, Sy, T), axes=(-3, -2, -1)).astype(jnp.float32)


# ----------------------------------------------------------------------------
# Pure-JAX reference (mirrors the PyTorch module exactly) for validation
# ----------------------------------------------------------------------------

def spectral_conv3d_ref(x, wr, wi):
    B, Ci, Sx, Sy, T = x.shape
    _, _, Co, m1, m2, m3 = wr.shape
    w = lax.complex(wr, wi)                           # (4, Ci, Co, m1, m2, m3)
    x_ft = jnp.fft.rfftn(x, axes=(-3, -2, -1))
    Tr = T // 2 + 1

    def mul(inp, wc):
        return jnp.einsum('bixyz,ioxyz->boxyz', inp, wc)

    out_ft = jnp.zeros((B, Co, Sx, Sy, Tr), dtype=jnp.complex64)
    out_ft = out_ft.at[:, :, :m1, :m2, :m3].set(mul(x_ft[:, :, :m1, :m2, :m3], w[0]))
    out_ft = out_ft.at[:, :, -m1:, :m2, :m3].set(mul(x_ft[:, :, -m1:, :m2, :m3], w[1]))
    out_ft = out_ft.at[:, :, :m1, -m2:, :m3].set(mul(x_ft[:, :, :m1, -m2:, :m3], w[2]))
    out_ft = out_ft.at[:, :, -m1:, -m2:, :m3].set(mul(x_ft[:, :, -m1:, -m2:, :m3], w[3]))
    return jnp.fft.irfftn(out_ft, s=(Sx, Sy, T), axes=(-3, -2, -1)).astype(jnp.float32)


# ----------------------------------------------------------------------------
# Main
# ----------------------------------------------------------------------------

if __name__ == "__main__":
    key = jax.random.PRNGKey(0)
    kx, kwr, kwi = jax.random.split(key, 3)

    # Small shapes: batch=2, in_channels=4, out_channels=8,
    # spatial 16x16, time 8, modes (4, 4, 4)  [modes3 <= T//2+1 = 5].
    B, Ci, Co = 2, 4, 8
    Sx, Sy, T = 16, 16, 8
    m1, m2, m3 = 4, 4, 4

    x = jax.random.normal(kx, (B, Ci, Sx, Sy, T), jnp.float32)

    # torch.rand(..., dtype=cfloat): real & imag each uniform in [0,1), scaled
    # by 1/(in_channels*out_channels).  Stacked over the 4 corner weights.
    scale = 1.0 / (Ci * Co)
    wr = scale * jax.random.uniform(kwr, (4, Ci, Co, m1, m2, m3), jnp.float32)
    wi = scale * jax.random.uniform(kwi, (4, Ci, Co, m1, m2, m3), jnp.float32)

    # Pack the weight layout ONCE (corner-major, re/im-stacked, lane-padded):
    # this replaces the per-call transpose+pad HBM passes of the old version.
    w_packed = jax.block_until_ready(pack_spectral_weights(wr, wi))

    fwd = jax.jit(functools.partial(spectral_conv3d, modes=(m1, m2, m3)))
    out = jax.block_until_ready(fwd(x, w_packed))

    assert out.shape == (B, Co, Sx, Sy, T), out.shape
    assert bool(jnp.all(jnp.isfinite(out)))

    # Numerical check against the pure-JAX reference of the PyTorch module.
    ref = jax.block_until_ready(spectral_conv3d_ref(x, wr, wi))
    err = float(jnp.max(jnp.abs(out - ref)))
    assert err < 1e-4, f"max abs err {err}"

    print("KERNEL_OK")
</pallas_src>

<mosaic_0001>
module attributes {stable_mosaic.version = 11 : i64} {
  func.func @_spec_mul_kernel(%arg0: i32, %arg1: i32, %arg2: memref<8x2x128xf32, #tpu.memory_space<vmem>>, %arg3: memref<8x8x128xf32, #tpu.memory_space<vmem>>, %arg4: memref<4x8x128xf32, #tpu.memory_space<vmem>>) attributes {dimension_semantics = [#tpu.dimension_semantics<parallel>, #tpu.dimension_semantics<parallel>], iteration_bounds = array<i64: 2, 1>, scalar_prefetch = 0 : i64, scratch_operands = 0 : i64, tpu.core_type = #tpu.core_type<tc>, window_params = [{transform_indices = @transform_0, window_bounds = array<i64: 8, 2, 128>}, {transform_indices = @transform_1, window_bounds = array<i64: 8, 8, 128>}, {transform_indices = @transform_2, window_bounds = array<i64: 4, 8, 128>}]} {
    %cst = arith.constant 0.000000e+00 : f32
    %0 = vector.broadcast %cst : f32 to vector<8x128xf32>
    %cst_0 = arith.constant 0.000000e+00 : f32
    %1 = vector.broadcast %cst_0 : f32 to vector<8x128xf32>
    %c0_i32 = arith.constant 0 : i32
    %2 = arith.index_cast %c0_i32 : i32 to index
    %c0 = arith.constant 0 : index
    %c0_1 = arith.constant 0 : index
    %3 = vector.load %arg2[%2, %c0, %c0_1] : memref<8x2x128xf32, #tpu.memory_space<vmem>>, vector<1x1x128xf32>
    %4 = vector.shape_cast %3 : vector<1x1x128xf32> to vector<1x128xf32>
    %c4_i32 = arith.constant 4 : i32
    %5 = arith.addi %c4_i32, %c0_i32 : i32
    %6 = arith.index_cast %5 : i32 to index
    %c0_2 = arith.constant 0 : index
    %c0_3 = arith.constant 0 : index
    %7 = vector.load %arg2[%6, %c0_2, %c0_3] : memref<8x2x128xf32, #tpu.memory_space<vmem>>, vector<1x1x128xf32>
    %8 = vector.shape_cast %7 : vector<1x1x128xf32> to vector<1x128xf32>
    %9 = arith.index_cast %c0_i32 : i32 to index
    %c0_4 = arith.constant 0 : index
    %c0_5 = arith.constant 0 : index
    %10 = vector.load %arg3[%9, %c0_4, %c0_5] : memref<8x8x128xf32, #tpu.memory_space<vmem>>, vector<1x8x128xf32>
    %11 = vector.shape_cast %10 : vector<1x8x128xf32> to vector<8x128xf32>
    %c4_i32_6 = arith.constant 4 : i32
    %12 = arith.addi %c4_i32_6, %c0_i32 : i32
    %13 = arith.index_cast %12 : i32 to index
    %c0_7 = arith.constant 0 : index
    %c0_8 = arith.constant 0 : index
    %14 = vector.load %arg3[%13, %c0_7, %c0_8] : memref<8x8x128xf32, #tpu.memory_space<vmem>>, vector<1x8x128xf32>
    %15 = vector.shape_cast %14 : vector<1x8x128xf32> to vector<8x128xf32>
    %16 = vector.broadcast %4 : vector<1x128xf32> to vector<8x128xf32>
    %17 = arith.mulf %16, %11 : vector<8x128xf32>
    %18 = arith.addf %0, %17 : vector<8x128xf32>
    %19 = vector.broadcast %8 : vector<1x128xf32> to vector<8x128xf32>
    %20 = arith.mulf %19, %15 : vector<8x128xf32>
    %21 = arith.subf %18, %20 : vector<8x128xf32>
    %22 = vector.broadcast %4 : vector<1x128xf32> to vector<8x128xf32>
    %23 = arith.mulf %22, %15 : vector<8x128xf32>
    %24 = arith.addf %1, %23 : vector<8x128xf32>
    %25 = vector.broadcast %8 : vector<1x128xf32> to vector<8x128xf32>
    %26 = arith.mulf %25, %11 : vector<8x128xf32>
    %27 = arith.addf %24, %26 : vector<8x128xf32>
    %c1_i32 = arith.constant 1 : i32
    %28 = arith.index_cast %c1_i32 : i32 to index
    %c0_9 = arith.constant 0 : index
    %c0_10 = arith.constant 0 : index
    %29 = vector.load %arg2[%28, %c0_9, %c0_10] : memref<8x2x128xf32, #tpu.memory_space<vmem>>, vector<1x1x128xf32>
    %30 = vector.shape_cast %29 : vector<1x1x128xf32> to vector<1x128xf32>
    %c4_i32_11 = arith.constant 4 : i32
    %31 = arith.addi %c4_i32_11, %c1_i32 : i32
    %32 = arith.index_cast %31 : i32 to index
    %c0_12 = arith.constant 0 : index
    %c0_13 = arith.constant 0 : index
    %33 = vector.load %arg2[%32, %c0_12, %c0_13] : memref<8x2x128xf32, #tpu.memory_space<vmem>>, vector<1x1x128xf32>
    %34 = vector.shape_cast %33 : vector<1x1x128xf32> to vector<1x128xf32>
    %35 = arith.index_cast %c1_i32 : i32 to index
    %c0_14 = arith.constant 0 : index
    %c0_15 = arith.constant 0 : index
    %36 = vector.load %arg3[%35, %c0_14, %c0_15] : memref<8x8x128xf32, #tpu.memory_space<vmem>>, vector<1x8x128xf32>
    %37 = vector.shape_cast %36 : vector<1x8x128xf32> to vector<8x128xf32>
    %c4_i32_16 = arith.constant 4 : i32
    %38 = arith.addi %c4_i32_16, %c1_i32 : i32
    %39 = arith.index_cast %38 : i32 to index
    %c0_17 = arith.constant 0 : index
    %c0_18 = arith.constant 0 : index
    %40 = vector.load %arg3[%39, %c0_17, %c0_18] : memref<8x8x128xf32, #tpu.memory_space<vmem>>, vector<1x8x128xf32>
    %41 = vector.shape_cast %40 : vector<1x8x128xf32> to vector<8x128xf32>
    %42 = vector.broadcast %30 : vector<1x128xf32> to vector<8x128xf32>
    %43 = arith.mulf %42, %37 : vector<8x128xf32>
    %44 = arith.addf %21, %43 : vector<8x128xf32>
    %45 = vector.broadcast %34 : vector<1x128xf32> to vector<8x128xf32>
    %46 = arith.mulf %45, %41 : vector<8x128xf32>
    %47 = arith.subf %44, %46 : vector<8x128xf32>
    %48 = vector.broadcast %30 : vector<1x128xf32> to vector<8x128xf32>
    %49 = arith.mulf %48, %41 : vector<8x128xf32>
    %50 = arith.addf %27, %49 : vector<8x128xf32>
    %51 = vector.broadcast %34 : vector<1x128xf32> to vector<8x128xf32>
    %52 = arith.mulf %51, %37 : vector<8x128xf32>
    %53 = arith.addf %50, %52 : vector<8x128xf32>
    %c2_i32 = arith.constant 2 : i32
    %54 = arith.index_cast %c2_i32 : i32 to index
    %c0_19 = arith.constant 0 : index
    %c0_20 = arith.constant 0 : index
    %55 = vector.load %arg2[%54, %c0_19, %c0_20] : memref<8x2x128xf32, #tpu.memory_space<vmem>>, vector<1x1x128xf32>
    %56 = vector.shape_cast %55 : vector<1x1x128xf32> to vector<1x128xf32>
    %c4_i32_21 = arith.constant 4 : i32
    %57 = arith.addi %c4_i32_21, %c2_i32 : i32
    %58 = arith.index_cast %57 : i32 to index
    %c0_22 = arith.constant 0 : index
    %c0_23 = arith.constant 0 : index
    %59 = vector.load %arg2[%58, %c0_22, %c0_23] : memref<8x2x128xf32, #tpu.memory_space<vmem>>, vector<1x1x128xf32>
    %60 = vector.shape_cast %59 : vector<1x1x128xf32> to vector<1x128xf32>
    %61 = arith.index_cast %c2_i32 : i32 to index
    %c0_24 = arith.constant 0 : index
    %c0_25 = arith.constant 0 : index
    %62 = vector.load %arg3[%61, %c0_24, %c0_25] : memref<8x8x128xf32, #tpu.memory_space<vmem>>, vector<1x8x128xf32>
    %63 = vector.shape_cast %62 : vector<1x8x128xf32> to vector<8x128xf32>
    %c4_i32_26 = arith.constant 4 : i32
    %64 = arith.addi %c4_i32_26, %c2_i32 : i32
    %65 = arith.index_cast %64 : i32 to index
    %c0_27 = arith.constant 0 : index
    %c0_28 = arith.constant 0 : index
    %66 = vector.load %arg3[%65, %c0_27, %c0_28] : memref<8x8x128xf32, #tpu.memory_space<vmem>>, vector<1x8x128xf32>
    %67 = vector.shape_cast %66 : vector<1x8x128xf32> to vector<8x128xf32>
    %68 = vector.broadcast %56 : vector<1x128xf32> to vector<8x128xf32>
    %69 = arith.mulf %68, %63 : vector<8x128xf32>
    %70 = arith.addf %47, %69 : vector<8x128xf32>
    %71 = vector.broadcast %60 : vector<1x128xf32> to vector<8x128xf32>
    %72 = arith.mulf %71, %67 : vector<8x128xf32>
    %73 = arith.subf %70, %72 : vector<8x128xf32>
    %74 = vector.broadcast %56 : vector<1x128xf32> to vector<8x128xf32>
    %75 = arith.mulf %74, %67 : vector<8x128xf32>
    %76 = arith.addf %53, %75 : vector<8x128xf32>
    %77 = vector.broadcast %60 : vector<1x128xf32> to vector<8x128xf32>
    %78 = arith.mulf %77, %63 : vector<8x128xf32>
    %79 = arith.addf %76, %78 : vector<8x128xf32>
    %c3_i32 = arith.constant 3 : i32
    %80 = arith.index_cast %c3_i32 : i32 to index
    %c0_29 = arith.constant 0 : index
    %c0_30 = arith.constant 0 : index
    %81 = vector.load %arg2[%80, %c0_29, %c0_30] : memref<8x2x128xf32, #tpu.memory_space<vmem>>, vector<1x1x128xf32>
    %82 = vector.shape_cast %81 : vector<1x1x128xf32> to vector<1x128xf32>
    %c4_i32_31 = arith.constant 4 : i32
    %83 = arith.addi %c4_i32_31, %c3_i32 : i32
    %84 = arith.index_cast %83 : i32 to index
    %c0_32 = arith.constant 0 : index
    %c0_33 = arith.constant 0 : index
    %85 = vector.load %arg2[%84, %c0_32, %c0_33] : memref<8x2x128xf32, #tpu.memory_space<vmem>>, vector<1x1x128xf32>
    %86 = vector.shape_cast %85 : vector<1x1x128xf32> to vector<1x128xf32>
    %87 = arith.index_cast %c3_i32 : i32 to index
    %c0_34 = arith.constant 0 : index
    %c0_35 = arith.constant 0 : index
    %88 = vector.load %arg3[%87, %c0_34, %c0_35] : memref<8x8x128xf32, #tpu.memory_space<vmem>>, vector<1x8x128xf32>
    %89 = vector.shape_cast %88 : vector<1x8x128xf32> to vector<8x128xf32>
    %c4_i32_36 = arith.constant 4 : i32
    %90 = arith.addi %c4_i32_36, %c3_i32 : i32
    %91 = arith.index_cast %90 : i32 to index
    %c0_37 = arith.constant 0 : index
    %c0_38 = arith.constant 0 : index
    %92 = vector.load %arg3[%91, %c0_37, %c0_38] : memref<8x8x128xf32, #tpu.memory_space<vmem>>, vector<1x8x128xf32>
    %93 = vector.shape_cast %92 : vector<1x8x128xf32> to vector<8x128xf32>
    %94 = vector.broadcast %82 : vector<1x128xf32> to vector<8x128xf32>
    %95 = arith.mulf %94, %89 : vector<8x128xf32>
    %96 = arith.addf %73, %95 : vector<8x128xf32>
    %97 = vector.broadcast %86 : vector<1x128xf32> to vector<8x128xf32>
    %98 = arith.mulf %97, %93 : vector<8x128xf32>
    %99 = arith.subf %96, %98 : vector<8x128xf32>
    %100 = vector.broadcast %82 : vector<1x128xf32> to vector<8x128xf32>
    %101 = arith.mulf %100, %93 : vector<8x128xf32>
    %102 = arith.addf %79, %101 : vector<8x128xf32>
    %103 = vector.broadcast %86 : vector<1x128xf32> to vector<8x128xf32>
    %104 = arith.mulf %103, %89 : vector<8x128xf32>
    %105 = arith.addf %102, %104 : vector<8x128xf32>
    %c4_i32_39 = arith.constant 4 : i32
    %c0_40 = arith.constant 0 : index
    %c0_41 = arith.constant 0 : index
    %c0_42 = arith.constant 0 : index
    %106 = vector.load %arg4[%c0_40, %c0_41, %c0_42] : memref<4x8x128xf32, #tpu.memory_space<vmem>>, vector<1x8x128xf32>
    %107 = vector.shape_cast %106 : vector<1x8x128xf32> to vector<8x128xf32>
    %108 = vector.shape_cast %99 : vector<8x128xf32> to vector<1x8x128xf32>
    tpu.vector_store %arg4[%c0_40, %c0_41, %c0_42], %108 {strides = array<i32>} : memref<4x8x128xf32, #tpu.memory_space<vmem>>, vector<1x8x128xf32>,
    %c2 = arith.constant 2 : index
    %c0_43 = arith.constant 0 : index
    %c0_44 = arith.constant 0 : index
    %109 = vector.load %arg4[%c2, %c0_43, %c0_44] : memref<4x8x128xf32, #tpu.memory_space<vmem>>, vector<1x8x128xf32>
    %110 = vector.shape_cast %109 : vector<1x8x128xf32> to vector<8x128xf32>
    %111 = vector.shape_cast %105 : vector<8x128xf32> to vector<1x8x128xf32>
    tpu.vector_store %arg4[%c2, %c0_43, %c0_44], %111 {strides = array<i32>} : memref<4x8x128xf32, #tpu.memory_space<vmem>>, vector<1x8x128xf32>,
    %cst_45 = arith.constant 0.000000e+00 : f32
    %112 = vector.broadcast %cst_45 : f32 to vector<8x128xf32>
    %cst_46 = arith.constant 0.000000e+00 : f32
    %113 = vector.broadcast %cst_46 : f32 to vector<8x128xf32>
    %c0_i32_47 = arith.constant 0 : i32
    %114 = arith.index_cast %c0_i32_47 : i32 to index
    %c1 = arith.constant 1 : index
    %c0_48 = arith.constant 0 : index
    %115 = vector.load %arg2[%114, %c1, %c0_48] : memref<8x2x128xf32, #tpu.memory_space<vmem>>, vector<1x1x128xf32>
    %116 = vector.shape_cast %115 : vector<1x1x128xf32> to vector<1x128xf32>
    %c4_i32_49 = arith.constant 4 : i32
    %117 = arith.addi %c4_i32_49, %c0_i32_47 : i32
    %118 = arith.index_cast %117 : i32 to index
    %c1_50 = arith.constant 1 : index
    %c0_51 = arith.constant 0 : index
    %119 = vector.load %arg2[%118, %c1_50, %c0_51] : memref<8x2x128xf32, #tpu.memory_space<vmem>>, vector<1x1x128xf32>
    %120 = vector.shape_cast %119 : vector<1x1x128xf32> to vector<1x128xf32>
    %121 = arith.index_cast %c0_i32_47 : i32 to index
    %c0_52 = arith.constant 0 : index
    %c0_53 = arith.constant 0 : index
    %122 = vector.load %arg3[%121, %c0_52, %c0_53] : memref<8x8x128xf32, #tpu.memory_space<vmem>>, vector<1x8x128xf32>
    %123 = vector.shape_cast %122 : vector<1x8x128xf32> to vector<8x128xf32>
    %c4_i32_54 = arith.constant 4 : i32
    %124 = arith.addi %c4_i32_54, %c0_i32_47 : i32
    %125 = arith.index_cast %124 : i32 to index
    %c0_55 = arith.constant 0 : index
    %c0_56 = arith.constant 0 : index
    %126 = vector.load %arg3[%125, %c0_55, %c0_56] : memref<8x8x128xf32, #tpu.memory_space<vmem>>, vector<1x8x128xf32>
    %127 = vector.shape_cast %126 : vector<1x8x128xf32> to vector<8x128xf32>
    %128 = vector.broadcast %116 : vector<1x128xf32> to vector<8x128xf32>
    %129 = arith.mulf %128, %123 : vector<8x128xf32>
    %130 = arith.addf %112, %129 : vector<8x128xf32>
    %131 = vector.broadcast %120 : vector<1x128xf32> to vector<8x128xf32>
    %132 = arith.mulf %131, %127 : vector<8x128xf32>
    %133 = arith.subf %130, %132 : vector<8x128xf32>
    %134 = vector.broadcast %116 : vector<1x128xf32> to vector<8x128xf32>
    %135 = arith.mulf %134, %127 : vector<8x128xf32>
    %136 = arith.addf %113, %135 : vector<8x128xf32>
    %137 = vector.broadcast %120 : vector<1x128xf32> to vector<8x128xf32>
    %138 = arith.mulf %137, %123 : vector<8x128xf32>
    %139 = arith.addf %136, %138 : vector<8x128xf32>
    %c1_i32_57 = arith.constant 1 : i32
    %140 = arith.index_cast %c1_i32_57 : i32 to index
    %c1_58 = arith.constant 1 : index
    %c0_59 = arith.constant 0 : index
    %141 = vector.load %arg2[%140, %c1_58, %c0_59] : memref<8x2x128xf32, #tpu.memory_space<vmem>>, vector<1x1x128xf32>
    %142 = vector.shape_cast %141 : vector<1x1x128xf32> to vector<1x128xf32>
    %c4_i32_60 = arith.constant 4 : i32
    %143 = arith.addi %c4_i32_60, %c1_i32_57 : i32
    %144 = arith.index_cast %143 : i32 to index
    %c1_61 = arith.constant 1 : index
    %c0_62 = arith.constant 0 : index
    %145 = vector.load %arg2[%144, %c1_61, %c0_62] : memref<8x2x128xf32, #tpu.memory_space<vmem>>, vector<1x1x128xf32>
    %146 = vector.shape_cast %145 : vector<1x1x128xf32> to vector<1x128xf32>
    %147 = arith.index_cast %c1_i32_57 : i32 to index
    %c0_63 = arith.constant 0 : index
    %c0_64 = arith.constant 0 : index
    %148 = vector.load %arg3[%147, %c0_63, %c0_64] : memref<8x8x128xf32, #tpu.memory_space<vmem>>, vector<1x8x128xf32>
    %149 = vector.shape_cast %148 : vector<1x8x128xf32> to vector<8x128xf32>
    %c4_i32_65 = arith.constant 4 : i32
    %150 = arith.addi %c4_i32_65, %c1_i32_57 : i32
    %151 = arith.index_cast %150 : i32 to index
    %c0_66 = arith.constant 0 : index
    %c0_67 = arith.constant 0 : index
    %152 = vector.load %arg3[%151, %c0_66, %c0_67] : memref<8x8x128xf32, #tpu.memory_space<vmem>>, vector<1x8x128xf32>
    %153 = vector.shape_cast %152 : vector<1x8x128xf32> to vector<8x128xf32>
    %154 = vector.broadcast %142 : vector<1x128xf32> to vector<8x128xf32>
    %155 = arith.mulf %154, %149 : vector<8x128xf32>
    %156 = arith.addf %133, %155 : vector<8x128xf32>
    %157 = vector.broadcast %146 : vector<1x128xf32> to vector<8x128xf32>
    %158 = arith.mulf %157, %153 : vector<8x128xf32>
    %159 = arith.subf %156, %158 : vector<8x128xf32>
    %160 = vector.broadcast %142 : vector<1x128xf32> to vector<8x128xf32>
    %161 = arith.mulf %160, %153 : vector<8x128xf32>
    %162 = arith.addf %139, %161 : vector<8x128xf32>
    %163 = vector.broadcast %146 : vector<1x128xf32> to vector<8x128xf32>
    %164 = arith.mulf %163, %149 : vector<8x128xf32>
    %165 = arith.addf %162, %164 : vector<8x128xf32>
    %c2_i32_68 = arith.constant 2 : i32
    %166 = arith.index_cast %c2_i32_68 : i32 to index
    %c1_69 = arith.constant 1 : index
    %c0_70 = arith.constant 0 : index
    %167 = vector.load %arg2[%166, %c1_69, %c0_70] : memref<8x2x128xf32, #tpu.memory_space<vmem>>, vector<1x1x128xf32>
    %168 = vector.shape_cast %167 : vector<1x1x128xf32> to vector<1x128xf32>
    %c4_i32_71 = arith.constant 4 : i32
    %169 = arith.addi %c4_i32_71, %c2_i32_68 : i32
    %170 = arith.index_cast %169 : i32 to index
    %c1_72 = arith.constant 1 : index
    %c0_73 = arith.constant 0 : index
    %171 = vector.load %arg2[%170, %c1_72, %c0_73] : memref<8x2x128xf32, #tpu.memory_space<vmem>>, vector<1x1x128xf32>
    %172 = vector.shape_cast %171 : vector<1x1x128xf32> to vector<1x128xf32>
    %173 = arith.index_cast %c2_i32_68 : i32 to index
    %c0_74 = arith.constant 0 : index
    %c0_75 = arith.constant 0 : index
    %174 = vector.load %arg3[%173, %c0_74, %c0_75] : memref<8x8x128xf32, #tpu.memory_space<vmem>>, vector<1x8x128xf32>
    %175 = vector.shape_cast %174 : vector<1x8x128xf32> to vector<8x128xf32>
    %c4_i32_76 = arith.constant 4 : i32
    %176 = arith.addi %c4_i32_76, %c2_i32_68 : i32
    %177 = arith.index_cast %176 : i32 to index
    %c0_77 = arith.constant 0 : index
    %c0_78 = arith.constant 0 : index
    %178 = vector.load %arg3[%177, %c0_77, %c0_78] : memref<8x8x128xf32, #tpu.memory_space<vmem>>, vector<1x8x128xf32>
    %179 = vector.shape_cast %178 : vector<1x8x128xf32> to vector<8x128xf32>
    %180 = vector.broadcast %168 : vector<1x128xf32> to vector<8x128xf32>
    %181 = arith.mulf %180, %175 : vector<8x128xf32>
    %182 = arith.addf %159, %181 : vector<8x128xf32>
    %183 = vector.broadcast %172 : vector<1x128xf32> to vector<8x128xf32>
    %184 = arith.mulf %183, %179 : vector<8x128xf32>
    %185 = arith.subf %182, %184 : vector<8x128xf32>
    %186 = vector.broadcast %168 : vector<1x128xf32> to vector<8x128xf32>
    %187 = arith.mulf %186, %179 : vector<8x128xf32>
    %188 = arith.addf %165, %187 : vector<8x128xf32>
    %189 = vector.broadcast %172 : vector<1x128xf32> to vector<8x128xf32>
    %190 = arith.mulf %189, %175 : vector<8x128xf32>
    %191 = arith.addf %188, %190 : vector<8x128xf32>
    %c3_i32_79 = arith.constant 3 : i32
    %192 = arith.index_cast %c3_i32_79 : i32 to index
    %c1_80 = arith.constant 1 : index
    %c0_81 = arith.constant 0 : index
    %193 = vector.load %arg2[%192, %c1_80, %c0_81] : memref<8x2x128xf32, #tpu.memory_space<vmem>>, vector<1x1x128xf32>
    %194 = vector.shape_cast %193 : vector<1x1x128xf32> to vector<1x128xf32>
    %c4_i32_82 = arith.constant 4 : i32
    %195 = arith.addi %c4_i32_82, %c3_i32_79 : i32
    %196 = arith.index_cast %195 : i32 to index
    %c1_83 = arith.constant 1 : index
    %c0_84 = arith.constant 0 : index
    %197 = vector.load %arg2[%196, %c1_83, %c0_84] : memref<8x2x128xf32, #tpu.memory_space<vmem>>, vector<1x1x128xf32>
    %198 = vector.shape_cast %197 : vector<1x1x128xf32> to vector<1x128xf32>
    %199 = arith.index_cast %c3_i32_79 : i32 to index
    %c0_85 = arith.constant 0 : index
    %c0_86 = arith.constant 0 : index
    %200 = vector.load %arg3[%199, %c0_85, %c0_86] : memref<8x8x128xf32, #tpu.memory_space<vmem>>, vector<1x8x128xf32>
    %201 = vector.shape_cast %200 : vector<1x8x128xf32> to vector<8x128xf32>
    %c4_i32_87 = arith.constant 4 : i32
    %202 = arith.addi %c4_i32_87, %c3_i32_79 : i32
    %203 = arith.index_cast %202 : i32 to index
    %c0_88 = arith.constant 0 : index
    %c0_89 = arith.constant 0 : index
    %204 = vector.load %arg3[%203, %c0_88, %c0_89] : memref<8x8x128xf32, #tpu.memory_space<vmem>>, vector<1x8x128xf32>
    %205 = vector.shape_cast %204 : vector<1x8x128xf32> to vector<8x128xf32>
    %206 = vector.broadcast %194 : vector<1x128xf32> to vector<8x128xf32>
    %207 = arith.mulf %206, %201 : vector<8x128xf32>
    %208 = arith.addf %185, %207 : vector<8x128xf32>
    %209 = vector.broadcast %198 : vector<1x128xf32> to vector<8x128xf32>
    %210 = arith.mulf %209, %205 : vector<8x128xf32>
    %211 = arith.subf %208, %210 : vector<8x128xf32>
    %212 = vector.broadcast %194 : vector<1x128xf32> to vector<8x128xf32>
    %213 = arith.mulf %212, %205 : vector<8x128xf32>
    %214 = arith.addf %191, %213 : vector<8x128xf32>
    %215 = vector.broadcast %198 : vector<1x128xf32> to vector<8x128xf32>
    %216 = arith.mulf %215, %201 : vector<8x128xf32>
    %217 = arith.addf %214, %216 : vector<8x128xf32>
    %c4_i32_90 = arith.constant 4 : i32
    %c1_91 = arith.constant 1 : index
    %c0_92 = arith.constant 0 : index
    %c0_93 = arith.constant 0 : index
    %218 = vector.load %arg4[%c1_91, %c0_92, %c0_93] : memref<4x8x128xf32, #tpu.memory_space<vmem>>, vector<1x8x128xf32>
    %219 = vector.shape_cast %218 : vector<1x8x128xf32> to vector<8x128xf32>
    %220 = vector.shape_cast %211 : vector<8x128xf32> to vector<1x8x128xf32>
    tpu.vector_store %arg4[%c1_91, %c0_92, %c0_93], %220 {strides = array<i32>} : memref<4x8x128xf32, #tpu.memory_space<vmem>>, vector<1x8x128xf32>,
    %c3 = arith.constant 3 : index
    %c0_94 = arith.constant 0 : index
    %c0_95 = arith.constant 0 : index
    %221 = vector.load %arg4[%c3, %c0_94, %c0_95] : memref<4x8x128xf32, #tpu.memory_space<vmem>>, vector<1x8x128xf32>
    %222 = vector.shape_cast %221 : vector<1x8x128xf32> to vector<8x128xf32>
    %223 = vector.shape_cast %217 : vector<8x128xf32> to vector<1x8x128xf32>
    tpu.vector_store %arg4[%c3, %c0_94, %c0_95], %223 {strides = array<i32>} : memref<4x8x128xf32, #tpu.memory_space<vmem>>, vector<1x8x128xf32>,
    return
  }
  func.func @transform_0(%arg0: i32, %arg1: i32) -> (i32, i32, i32) {
    %c0_i32 = arith.constant 0 : i32
    %c0_i32_0 = arith.constant 0 : i32
    %c0_i32_1 = arith.constant 0 : i32
    return %c0_i32, %c0_i32_0, %arg0 : i32, i32, i32
  }
  func.func @transform_1(%arg0: i32, %arg1: i32) -> (i32, i32, i32) {
    %c0_i32 = arith.constant 0 : i32
    %c0_i32_0 = arith.constant 0 : i32
    return %c0_i32, %arg1, %arg0 : i32, i32, i32
  }
  func.func @transform_2(%arg0: i32, %arg1: i32) -> (i32, i32, i32) {
    %c0_i32 = arith.constant 0 : i32
    %c0_i32_0 = arith.constant 0 : i32
    return %c0_i32, %arg1, %arg0 : i32, i32, i32
  }
}

</mosaic_0001>

<bundles_post_ra>
// kernel: spectral_conv3d.1
= control target key start
LH: loop header
LB: loop body
LE: loop exit
PB: predicated region body
PF: predicated region fallthrough
CT: control target
= control target key end

     0   :  { %s792_s9 = smov 0   ;;  %s794_s10 = smov 0   ;;  %s900_s0 = inlined_call_operand.vmem [shape: f32[8,2,256], index: 0, kind: input, shape index: {}]   ;;  %s901_s1 = inlined_call_operand.vmem [shape: f32[8,8,256], index: 1, kind: input, shape index: {}]   ;;  %s902_s2 = inlined_call_operand.vmem [shape: f32[4,8,256], index: 2, kind: output, shape index: {}]  }
   0x1   :  { %s796_s11 = smov 0   ;;  %s798_s12 = smov 0  }
   0x2   :  { %s800_s13 = smov 0  }
   0x3 LB: > { %s24_s14 = sadd.s32 1, %s771_s12  ;;  %s634_s15 = sadd.s32 4294967295, %s775_s13   ;;  %s775_s13 = sphi %s800_s13, %s12_s13   ;;  %s771_s12 = sphi %s798_s12, %s908_s12   ;;  %s767_s11 = sphi %s796_s11, %s907_s11   ;;  %s763_s10 = sphi %s794_s10, %s906_s10   ;;  %s759_s9 = sphi %s792_s9, %s905_s9  }
   0x4   : > { %p26_p0 = scmp.ge.s32.totalorder %s24_s14, 2  ;;  %p38_p1 = scmp.ne.s32.totalorder %s763_s10, %s759_s9 }
   0x5   : > { %p39_p2 = scmp.eq.s32.totalorder %s775_s13, 0  ;;  %p98_p4 = scmp.eq.s32.totalorder %s634_s15, 1 }
   0x6   : > { %s910_s14 = smov (%p26_p0, %s24_s14), 0  ;;  %s31_s18 = sadd.s32 1, %s763_s10 }
   0x7   : > { %p824_p3 = por %p39_p2, %p38_p1  ;;  %s28_s17 = ssub.s32 %s771_s12, %s910_s14 }
   0x8   : > { %p29_p5 = scmp.eq.s32.totalorder %s28_s17, 0  ;;  %p831_p6 = por %p98_p4, %p38_p1 }
   0x9   : > { %p637_p7 = scmp.ge.s32.totalorder %s775_s13, 2 }
   0xa   : > { %s836_s20 = scalar_select %p29_p5, %s763_s10, %s31_s18  }
   0xb   : > { %120 = sbr.rel (%p637_p7) target bundleno = 33 (0x21), region = 16 }
  0x10   : > { %123 = sbr.rel (!%p824_p3) target bundleno = 25 (0x19), region = 20  ;;  %s125_s21 = sand.u32 (%p824_p3), 1, %s763_s10  }
  0x11   : > { %s639_s22 = sshll.u32 (%p824_p3), %s771_s12, 1  ;;  %s638_s23 = sshll.u32 (%p824_p3), %s125_s21, 4 }
  0x12   : > { %s129_s26 = scalar_lea.vmem (%p824_p3), %s900_s0, %s639_s22  ;;  %s127_s27 = scalar_lea.vmem (%p824_p3), [#allocation2], %s638_s23 }
  0x13   : > { %v146_v0 = vld [vmem:[%s129_s26] sm:$0x3] (%p824_p3)  ;;  %v148_v1 = vld [vmem:[%s129_s26 + $0x4] sm:$0x3] (%p824_p3)  ;;  %v150_v2 = vld [vmem:[%s129_s26 + $0x8] sm:$0x3] (%p824_p3) }
  0x14   : > { %147 = vst [vmem:[%s127_s27] sm:$0x3] (%p824_p3), %v146_v0  ;;  %149 = vst [vmem:[%s127_s27 + $0x2] sm:$0x3] (%p824_p3), %v148_v1  ;;  %v152_v3 = vld [vmem:[%s129_s26 + $0xc] sm:$0x3] (%p824_p3) }
  0x15   : > { %v154_v4 = vld [vmem:[%s129_s26 + $0x10] sm:$0x3]  ;;  %151 = vst [vmem:[%s127_s27 + $0x4] sm:$0x3] %v150_v2  ;;  %153 = vst [vmem:[%s127_s27 + $0x6] sm:$0x3] %v152_v3 }
  0x16   : > { %155 = vst [vmem:[%s127_s27 + $0x8] sm:$0x3] %v154_v4  ;;  %v156_v5 = vld [vmem:[%s129_s26 + $0x14] sm:$0x3]  ;;  %v158_v6 = vld [vmem:[%s129_s26 + $0x18] sm:$0x3] }
  0x17   : > { %v160_v7 = vld [vmem:[%s129_s26 + $0x1c] sm:$0x3]  ;;  %157 = vst [vmem:[%s127_s27 + $0xa] sm:$0x3] %v156_v5  ;;  %159 = vst [vmem:[%s127_s27 + $0xc] sm:$0x3] %v158_v6 }
  0x18   : > { %161 = vst [vmem:[%s127_s27 + $0xe] sm:$0x3] %v160_v7 }
  0x19 PF: > { %201 = sbr.rel (!%p824_p3) target bundleno = 33 (0x21), region = 61  ;;  %s203_s28 = sand.u32 (%p824_p3), 1, %s763_s10  }
  0x1a   : > { %s641_s29 = sshll.u32 (%p824_p3), %s771_s12, 3  ;;  %s640_s30 = sshll.u32 (%p824_p3), %s203_s28, 6 }
  0x1b   : > { %s209_s5 = scalar_lea.vmem (%p824_p3), %s901_s1, %s641_s29  ;;  %s205_s6 = scalar_lea.vmem (%p824_p3), [#allocation3], %s640_s30 }
  0x1c   : > { %v252_v8 = vld [vmem:[%s209_s5] sm:$0xff] (%p824_p3)  ;;  %v254_v9 = vld [vmem:[%s209_s5 + $0x10] sm:$0xff] (%p824_p3) }
  0x1d   : > { %v256_v10 = vld [vmem:[%s209_s5 + $0x20] sm:$0xff] (%p824_p3)  ;;  %253 = vst [vmem:[%s205_s6] sm:$0xff] (%p824_p3), %v252_v8  ;;  %255 = vst [vmem:[%s205_s6 + $0x8] sm:$0xff] (%p824_p3), %v254_v9  ;;  %v258_v11 = vld [vmem:[%s209_s5 + $0x30] sm:$0xff] (%p824_p3) }
  0x1e   : > { %257 = vst [vmem:[%s205_s6 + $0x10] sm:$0xff] %v256_v10  ;;  %v260_v12 = vld [vmem:[%s209_s5 + $0x40] sm:$0xff]  ;;  %v262_v13 = vld [vmem:[%s209_s5 + $0x50] sm:$0xff]  ;;  %259 = vst [vmem:[%s205_s6 + $0x18] sm:$0xff] %v258_v11 }
  0x1f   : > { %261 = vst [vmem:[%s205_s6 + $0x20] sm:$0xff] %v260_v12  ;;  %263 = vst [vmem:[%s205_s6 + $0x28] sm:$0xff] %v262_v13  ;;  %v264_v14 = vld [vmem:[%s209_s5 + $0x60] sm:$0xff]  ;;  %v266_v15 = vld [vmem:[%s209_s5 + $0x70] sm:$0xff] }
  0x20   : > { %265 = vst [vmem:[%s205_s6 + $0x30] sm:$0xff] %v264_v14  ;;  %267 = vst [vmem:[%s205_s6 + $0x38] sm:$0xff] %v266_v15 }
  0x21 PF: > { %p642_p8 = scmp.ge.s32.totalorder %s775_s13, 1  ;;  %p272_p9 = scmp.lt.s32.totalorder %s775_s13, 3 }
  0x23   : > { %p273_p10 = pnand %p642_p8, %p272_p9 }
  0x24   : > { %s856_s7 = sand.u32 (!%p273_p10), 1, %s759_s9  }
  0x25   : > { %276 = sbr.rel (%p273_p10) target bundleno = 75 (0x4b), region = 99  ;;  %s643_s8 = sshll.u32 (!%p273_p10), %s856_s7, 4 }
  0x26   : > { %s644_s15 = sshll.u32 (!%p273_p10), %s856_s7, 6  ;;  %s860_s16 = scalar_lea.vmem (!%p273_p10), [#allocation2], %s643_s8 }
  0x27   : > { %s288_s17 = scalar_lea.vmem (!%p273_p10), [#allocation3], %s644_s15  ;;  %s645_s9 = sshll.u32 (!%p273_p10), %s856_s7, 5 }
  0x28   : > { %s309_s18 = scalar_lea.vmem (!%p273_p10), [#allocation4], %s645_s9 }
  0x2a   : > { %v648_v16 = vld [vmem:[%s860_s16] ss:$0 sm:$0xff]  ;;  %v649_v17 = vld [vmem:[%s860_s16 + $0x8] ss:$0 sm:$0xff]  ;;  %v654_v21 = vld [vmem:[%s860_s16 + $0x2] ss:$0 sm:$0xff] }
  0x2b   : > { %v313_v18 = vld [vmem:[%s288_s17] sm:$0xff]  ;;  %v655_v22 = vld [vmem:[%s860_s16 + $0xa] ss:$0 sm:$0xff]  ;;  %v658_v30 = vld [vmem:[%s288_s17 + $0x10] sm:$0xff]  ;;  %s694_s21 = sshll.u32 (%p831_p6), %s767_s11, 3 }
  0x2c   : > { %v647_v19 = vld [vmem:[%s288_s17 + $0x20] sm:$0xff]  ;;  %v320_v20 = vmul.f32 %v648_v16, %v313_v18  ;;  %v330_v23 = vmul.f32 %v649_v17, %v313_v18  ;;  %v652_v25 = vld [vmem:[%s288_s17 + $0x8] sm:$0xff]  ;;  %v659_v31 = vld [vmem:[%s288_s17 + $0x30] sm:$0xff]  ;;  %s501_s24 = scalar_lea.vmem (%p831_p6), %s902_s2, %s694_s21 }
  0x2d   : > { %v326_v24 = vmul.f32 %v649_v17, %v647_v19  ;;  %v653_v26 = vld [vmem:[%s288_s17 + $0x28] sm:$0xff]  ;;  %v328_v27 = vmul.f32 %v648_v16, %v647_v19  ;;  %v344_v28 = vmul.f32 %v654_v21, %v652_v25  ;;  %v660_v29 = vld [vmem:[%s860_s16 + $0x4] ss:$0 sm:$0xff]  ;;  %v666_v36 = vld [vmem:[%s860_s16 + $0x6] ss:$0 sm:$0xff]  ;;  %v354_v38 = vmul.f32 %v655_v22, %v652_v25 }
  0x2e   : > { %v352_v32 = vmul.f32 %v654_v21, %v653_v26  ;;  %v350_v34 = vmul.f32 %v655_v22, %v653_v26  ;;  %v661_v35 = vld [vmem:[%s860_s16 + $0xc] ss:$0 sm:$0xff]  ;;  %v671_v40 = vld [vmem:[%s860_s16 + $0x1] ss:$0 sm:$0xff]  ;;  %v672_v41 = vld [vmem:[%s860_s16 + $0x9] ss:$0 sm:$0xff]  ;;  %v368_v43 = vmul.f32 %v660_v29, %v658_v30  ;;  %v376_v46 = vmul.f32 %v660_v29, %v659_v31 }
  0x2f   : > { %v327_v33 = vsub.f32 %v320_v20, %v326_v24  ;;  %v331_v37 = vadd.f32 %v330_v23, %v328_v27  ;;  %v664_v39 = vld [vmem:[%s288_s17 + $0x18] sm:$0xff]  ;;  %v677_v47 = vld [vmem:[%s860_s16 + $0x3] ss:$0 sm:$0xff]  ;;  %v374_v49 = vmul.f32 %v661_v35, %v659_v31  ;;  %v415_v50 = vmul.f32 %v671_v40, %v313_v18  ;;  %v683_v58 = vld [vmem:[%s860_s16 + $0x5] ss:$0 sm:$0xff] }
  0x30   : > { %v665_v44 = vld [vmem:[%s288_s17 + $0x38] sm:$0xff]  ;;  %v421_v51 = vmul.f32 %v672_v41, %v647_v19  ;;  %v435_v52 = vmul.f32 %v677_v47, %v652_v25  ;;  %v392_v55 = vmul.f32 %v666_v36, %v664_v39  ;;  %v378_v57 = vmul.f32 %v661_v35, %v658_v30  ;;  %v689_v10 = vld [vmem:[%s860_s16 + $0x7] ss:$0 sm:$0xff] }
  0x31   : > { %v345_v42 = vadd.f32 %v344_v28, %v327_v33  ;;  %v353_v45 = vadd.f32 %v352_v32, %v331_v37  ;;  %v678_v48 = vld [vmem:[%s860_s16 + $0xb] ss:$0 sm:$0xff]  ;;  %v667_v54 = vld [vmem:[%s860_s16 + $0xe] ss:$0 sm:$0xff]  ;;  %v400_v59 = vmul.f32 %v666_v36, %v665_v44  ;;  %v423_v62 = vmul.f32 %v671_v40, %v647_v19  ;;  %v684_v1 = vld [vmem:[%s860_s16 + $0xd] ss:$0 sm:$0xff] }
  0x32   : > { %v422_v60 = vsub.f32 %v415_v50, %v421_v51  ;;  %v441_v61 = vmul.f32 %v678_v48, %v653_v26  ;;  %v425_v2 = vmul.f32 %v672_v41, %v313_v18  ;;  %v443_v3 = vmul.f32 %v677_v47, %v653_v26  ;;  %v690_v17 = vld [vmem:[%s860_s16 + $0xf] ss:$0 sm:$0xff] }
  0x33   : > { %v351_v53 = vsub.f32 %v345_v42, %v350_v34  ;;  %v355_v56 = vadd.f32 %v354_v38, %v353_v45  ;;  %v398_v4 = vmul.f32 %v667_v54, %v665_v44  ;;  %v402_v5 = vmul.f32 %v667_v54, %v664_v39 }
  0x34   : > { %v436_v6 = vadd.f32 %v435_v52, %v422_v60  ;;  %v455_v7 = vmul.f32 %v683_v58, %v658_v30  ;;  %v426_v11 = vadd.f32 %v425_v2, %v423_v62  ;;  %v445_v12 = vmul.f32 %v678_v48, %v652_v25 }
  0x35   : > { %v369_v63 = vadd.f32 %v368_v43, %v351_v53  ;;  %v377_v0 = vadd.f32 %v376_v46, %v355_v56  ;;  %v461_v14 = vmul.f32 %v684_v1, %v659_v31  ;;  %v463_v20 = vmul.f32 %v683_v58, %v659_v31 }
  0x36   : > { %v442_v13 = vsub.f32 %v436_v6, %v441_v61  ;;  %v444_v19 = vadd.f32 %v443_v3, %v426_v11  ;;  %v475_v21 = vmul.f32 %v689_v10, %v664_v39  ;;  %v465_v26 = vmul.f32 %v684_v1, %v658_v30 }
  0x37   : > { %v375_v8 = vsub.f32 %v369_v63, %v374_v49  ;;  %v379_v9 = vadd.f32 %v378_v57, %v377_v0  ;;  %v481_v28 = vmul.f32 %v690_v17, %v665_v44  ;;  %v483_v25 = vmul.f32 %v689_v10, %v665_v44 }
  0x38   : > { %v456_v18 = vadd.f32 %v455_v7, %v442_v13  ;;  %v446_v24 = vadd.f32 %v445_v12, %v444_v19  ;;  %v485_v34 = vmul.f32 %v690_v17, %v664_v39 }
  0x39   : > { %v393_v15 = vadd.f32 %v392_v55, %v375_v8  ;;  %v401_v16 = vadd.f32 %v400_v59, %v379_v9 }
  0x3a   : > { %v462_v27 = vsub.f32 %v456_v18, %v461_v14  ;;  %v464_v29 = vadd.f32 %v463_v20, %v446_v24 }
  0x3b   : > { %v399_v22 = vsub.f32 %v393_v15, %v398_v4  ;;  %v403_v23 = vadd.f32 %v402_v5, %v401_v16 }
  0x3c   : > { %v476_v32 = vadd.f32 %v475_v21, %v462_v27  ;;  %v466_v33 = vadd.f32 %v465_v26, %v464_v29 }
  0x3d   : > { %404 = vst [vmem:[%s309_s18] sm:$0xff] %v399_v22  ;;  %668 = vst [vmem:[%s309_s18 + $0x10] sm:$0xff] %v403_v23 }
  0x3e   : > { %v482_v35 = vsub.f32 %v476_v32, %v481_v28  ;;  %v484_v36 = vadd.f32 %v483_v25, %v466_v33  ;;  %497 = sbr.rel (!%p831_p6) target bundleno = 75 (0x4b), region = 111 }
  0x40   : > { %691 = vst [vmem:[%s309_s18 + $0x8] sm:$0xff] %v482_v35  ;;  %v486_v31 = vadd.f32 %v485_v34, %v484_v36 }
  0x42   : > { %692 = vst [vmem:[%s309_s18 + $0x18] sm:$0xff] %v486_v31 }
  0x44   : > { %v536_v30 = vld [vmem:[%s309_s18] sm:$0xff]  ;;  %v540_v38 = vld [vmem:[%s309_s18 + $0x10] sm:$0xff] }
  0x45   : > { %537 = vst [vmem:[%s501_s24] sm:$0xff] %v536_v30  ;;  %541 = vst [vmem:[%s501_s24 + $0x20] sm:$0xff] %v540_v38 }
  0x47   : > { %v538_v37 = vld [vmem:[%s309_s18 + $0x8] sm:$0xff] }
  0x48   : > { %539 = vst [vmem:[%s501_s24 + $0x10] sm:$0xff] %v538_v37 }
  0x49   : > { %v542_v40 = vld [vmem:[%s309_s18 + $0x18] sm:$0xff] }
  0x4a   : > { %543 = vst [vmem:[%s501_s24 + $0x30] sm:$0xff] %v542_v40 }
  0x4b PF: > { %s12_s13 = sadd.s32 1, %s775_s13   ;;  %s905_s9 = smov %s763_s10 }
  0x4c   : > { %p9_p11 = scmp.ge.s32.totalorder %s12_s13, 4   ;;  %s906_s10 = smov %s836_s20 }
  0x4d   : > { %s907_s11 = smov %s771_s12  ;;  %s908_s12 = smov %s910_s14 }
  0x4e   :  { %11 = sbr.rel (!%p9_p11) target bundleno = 3 (0x3), region = 205 }

// kernel: reverse.1
= control target key start
LH: loop header
LB: loop body
LE: loop exit
PB: predicated region body
PF: predicated region fallthrough
CT: control target
= control target key end

     0   :  { %s1160_s0 = inlined_call_operand.vmem [shape: f32[2,8,16,16,3], index: 0, kind: input, shape index: {}]   ;;  %s1161_s1 = inlined_call_operand.vmem [shape: f32[2,8,16,16,3], index: 1, kind: output, shape index: {}]  }
   0x1   :  { %v384_v0 = vld [vmem:[%s1160_s0 + $0x20] sm:$0xff]  ;;  %v387_v2 = vld [vmem:[%s1160_s0 + $0x50] sm:$0xff]  ;;  %v478_v48 = vld [vmem:[%s1160_s0 + $0x28] sm:$0xff] }
   0x2   :  { %v385_v1 = vld [vmem:[%s1160_s0 + $0x1a0] sm:$0xff]  ;;  %4 = vst [vmem:[%s1161_s1] sm:$0xff] %v384_v0  ;;  %388 = vst [vmem:[%s1161_s1 + $0x30] sm:$0xff] %v387_v2  ;;  %v389_v3 = vld [vmem:[%s1160_s0 + $0x1d0] sm:$0xff] }
   0x3   :  { %386 = vst [vmem:[%s1161_s1 + $0x180] sm:$0xff] %v385_v1  ;;  %v391_v4 = vld [vmem:[%s1160_s0 + $0x80] sm:$0xff]  ;;  %390 = vst [vmem:[%s1161_s1 + $0x1b0] sm:$0xff] %v389_v3  ;;  %v395_v6 = vld [vmem:[%s1160_s0 + $0xb0] sm:$0xff] }
   0x4   :  { %v393_v5 = vld [vmem:[%s1160_s0 + $0x200] sm:$0xff]  ;;  %392 = vst [vmem:[%s1161_s1 + $0x60] sm:$0xff] %v391_v4  ;;  %v397_v7 = vld [vmem:[%s1160_s0 + $0x230] sm:$0xff]  ;;  %396 = vst [vmem:[%s1161_s1 + $0x90] sm:$0xff] %v395_v6 }
   0x5   :  { %394 = vst [vmem:[%s1161_s1 + $0x1e0] sm:$0xff] %v393_v5  ;;  %v399_v8 = vld [vmem:[%s1160_s0 + $0xe0] sm:$0xff]  ;;  %398 = vst [vmem:[%s1161_s1 + $0x210] sm:$0xff] %v397_v7  ;;  %v403_v10 = vld [vmem:[%s1160_s0 + $0x110] sm:$0xff] }
   0x6   :  { %400 = vst [vmem:[%s1161_s1 + $0xc0] sm:$0xff] %v399_v8  ;;  %v401_v9 = vld [vmem:[%s1160_s0 + $0x260] sm:$0xff]  ;;  %v405_v11 = vld [vmem:[%s1160_s0 + $0x290] sm:$0xff]  ;;  %404 = vst [vmem:[%s1161_s1 + $0xf0] sm:$0xff] %v403_v10 }
   0x7   :  { %402 = vst [vmem:[%s1161_s1 + $0x240] sm:$0xff] %v401_v9  ;;  %406 = vst [vmem:[%s1161_s1 + $0x270] sm:$0xff] %v405_v11  ;;  %v407_v12 = vld [vmem:[%s1160_s0 + $0x140] sm:$0xff]  ;;  %v411_v14 = vld [vmem:[%s1160_s0 + $0x170] sm:$0xff] }
   0x8   :  { %v409_v13 = vld [vmem:[%s1160_s0 + $0x2c0] sm:$0xff]  ;;  %408 = vst [vmem:[%s1161_s1 + $0x120] sm:$0xff] %v407_v12  ;;  %412 = vst [vmem:[%s1161_s1 + $0x150] sm:$0xff] %v411_v14  ;;  %v413_v15 = vld [vmem:[%s1160_s0 + $0x2f0] sm:$0xff] }
   0x9   :  { %410 = vst [vmem:[%s1161_s1 + $0x2a0] sm:$0xff] %v409_v13  ;;  %v415_v16 = vld [vmem:[%s1160_s0 + $0x10] sm:$0xff]  ;;  %414 = vst [vmem:[%s1161_s1 + $0x2d0] sm:$0xff] %v413_v15  ;;  %v419_v18 = vld [vmem:[%s1160_s0 + $0x40] sm:$0xff] }
   0xa   :  { %v417_v17 = vld [vmem:[%s1160_s0 + $0x190] sm:$0xff]  ;;  %416 = vst [vmem:[%s1161_s1 + $0x10] sm:$0xff] %v415_v16  ;;  %v421_v19 = vld [vmem:[%s1160_s0 + $0x1c0] sm:$0xff]  ;;  %420 = vst [vmem:[%s1161_s1 + $0x40] sm:$0xff] %v419_v18 }
   0xb   :  { %418 = vst [vmem:[%s1161_s1 + $0x190] sm:$0xff] %v417_v17  ;;  %v423_v20 = vld [vmem:[%s1160_s0 + $0x70] sm:$0xff]  ;;  %422 = vst [vmem:[%s1161_s1 + $0x1c0] sm:$0xff] %v421_v19  ;;  %v427_v22 = vld [vmem:[%s1160_s0 + $0xa0] sm:$0xff] }
   0xc   :  { %424 = vst [vmem:[%s1161_s1 + $0x70] sm:$0xff] %v423_v20  ;;  %v425_v21 = vld [vmem:[%s1160_s0 + $0x1f0] sm:$0xff]  ;;  %v429_v23 = vld [vmem:[%s1160_s0 + $0x220] sm:$0xff]  ;;  %428 = vst [vmem:[%s1161_s1 + $0xa0] sm:$0xff] %v427_v22 }
   0xd   :  { %426 = vst [vmem:[%s1161_s1 + $0x1f0] sm:$0xff] %v425_v21  ;;  %430 = vst [vmem:[%s1161_s1 + $0x220] sm:$0xff] %v429_v23  ;;  %v431_v24 = vld [vmem:[%s1160_s0 + $0xd0] sm:$0xff]  ;;  %v435_v26 = vld [vmem:[%s1160_s0 + $0x100] sm:$0xff] }
   0xe   :  { %v433_v25 = vld [vmem:[%s1160_s0 + $0x250] sm:$0xff]  ;;  %432 = vst [vmem:[%s1161_s1 + $0xd0] sm:$0xff] %v431_v24  ;;  %436 = vst [vmem:[%s1161_s1 + $0x100] sm:$0xff] %v435_v26  ;;  %v437_v27 = vld [vmem:[%s1160_s0 + $0x280] sm:$0xff] }
   0xf   :  { %434 = vst [vmem:[%s1161_s1 + $0x250] sm:$0xff] %v433_v25  ;;  %v439_v28 = vld [vmem:[%s1160_s0 + $0x130] sm:$0xff]  ;;  %438 = vst [vmem:[%s1161_s1 + $0x280] sm:$0xff] %v437_v27  ;;  %v443_v30 = vld [vmem:[%s1160_s0 + $0x160] sm:$0xff] }
  0x10   :  { %v441_v29 = vld [vmem:[%s1160_s0 + $0x2b0] sm:$0xff]  ;;  %440 = vst [vmem:[%s1161_s1 + $0x130] sm:$0xff] %v439_v28  ;;  %v445_v31 = vld [vmem:[%s1160_s0 + $0x2e0] sm:$0xff]  ;;  %444 = vst [vmem:[%s1161_s1 + $0x160] sm:$0xff] %v443_v30 }
  0x11   :  { %442 = vst [vmem:[%s1161_s1 + $0x2b0] sm:$0xff] %v441_v29  ;;  %v129_v32 = vld [vmem:[%s1160_s0] sm:$0xff]  ;;  %446 = vst [vmem:[%s1161_s1 + $0x2e0] sm:$0xff] %v445_v31  ;;  %v450_v34 = vld [vmem:[%s1160_s0 + $0x30] sm:$0xff] }
  0x12   :  { %447 = vst [vmem:[%s1161_s1 + $0x20] sm:$0xff] %v129_v32  ;;  %v448_v33 = vld [vmem:[%s1160_s0 + $0x180] sm:$0xff]  ;;  %v452_v35 = vld [vmem:[%s1160_s0 + $0x1b0] sm:$0xff]  ;;  %451 = vst [vmem:[%s1161_s1 + $0x50] sm:$0xff] %v450_v34 }
  0x13   :  { %449 = vst [vmem:[%s1161_s1 + $0x1a0] sm:$0xff] %v448_v33  ;;  %453 = vst [vmem:[%s1161_s1 + $0x1d0] sm:$0xff] %v452_v35  ;;  %v454_v36 = vld [vmem:[%s1160_s0 + $0x60] sm:$0xff]  ;;  %v458_v38 = vld [vmem:[%s1160_s0 + $0x90] sm:$0xff] }
  0x14   :  { %v456_v37 = vld [vmem:[%s1160_s0 + $0x1e0] sm:$0xff]  ;;  %455 = vst [vmem:[%s1161_s1 + $0x80] sm:$0xff] %v454_v36  ;;  %459 = vst [vmem:[%s1161_s1 + $0xb0] sm:$0xff] %v458_v38  ;;  %v460_v39 = vld [vmem:[%s1160_s0 + $0x210] sm:$0xff] }
  0x15   :  { %457 = vst [vmem:[%s1161_s1 + $0x200] sm:$0xff] %v456_v37  ;;  %v462_v40 = vld [vmem:[%s1160_s0 + $0xc0] sm:$0xff]  ;;  %461 = vst [vmem:[%s1161_s1 + $0x230] sm:$0xff] %v460_v39  ;;  %v466_v42 = vld [vmem:[%s1160_s0 + $0xf0] sm:$0xff] }
  0x16   :  { %v464_v41 = vld [vmem:[%s1160_s0 + $0x240] sm:$0xff]  ;;  %463 = vst [vmem:[%s1161_s1 + $0xe0] sm:$0xff] %v462_v40  ;;  %v468_v43 = vld [vmem:[%s1160_s0 + $0x270] sm:$0xff]  ;;  %467 = vst [vmem:[%s1161_s1 + $0x110] sm:$0xff] %v466_v42 }
  0x17   :  { %465 = vst [vmem:[%s1161_s1 + $0x260] sm:$0xff] %v464_v41  ;;  %v470_v44 = vld [vmem:[%s1160_s0 + $0x120] sm:$0xff]  ;;  %469 = vst [vmem:[%s1161_s1 + $0x290] sm:$0xff] %v468_v43  ;;  %v474_v46 = vld [vmem:[%s1160_s0 + $0x150] sm:$0xff] }
  0x18   :  { %471 = vst [vmem:[%s1161_s1 + $0x140] sm:$0xff] %v470_v44  ;;  %v472_v45 = vld [vmem:[%s1160_s0 + $0x2a0] sm:$0xff]  ;;  %v476_v47 = vld [vmem:[%s1160_s0 + $0x2d0] sm:$0xff]  ;;  %475 = vst [vmem:[%s1161_s1 + $0x170] sm:$0xff] %v474_v46 }
  0x19   :  { %473 = vst [vmem:[%s1161_s1 + $0x2c0] sm:$0xff] %v472_v45  ;;  %477 = vst [vmem:[%s1161_s1 + $0x2f0] sm:$0xff] %v476_v47  ;;  %v480_v49 = vld [vmem:[%s1160_s0 + $0x1a8] sm:$0xff]  ;;  %v482_v50 = vld [vmem:[%s1160_s0 + $0x58] sm:$0xff] }
  0x1a   :  { %479 = vst [vmem:[%s1161_s1 + $0x8] sm:$0xff] %v478_v48  ;;  %481 = vst [vmem:[%s1161_s1 + $0x188] sm:$0xff] %v480_v49  ;;  %v484_v51 = vld [vmem:[%s1160_s0 + $0x1d8] sm:$0xff]  ;;  %v486_v52 = vld [vmem:[%s1160_s0 + $0x88] sm:$0xff] }
  0x1b   :  { %483 = vst [vmem:[%s1161_s1 + $0x38] sm:$0xff] %v482_v50  ;;  %v488_v53 = vld [vmem:[%s1160_s0 + $0x208] sm:$0xff]  ;;  %485 = vst [vmem:[%s1161_s1 + $0x1b8] sm:$0xff] %v484_v51  ;;  %v490_v54 = vld [vmem:[%s1160_s0 + $0xb8] sm:$0xff] }
  0x1c   :  { %487 = vst [vmem:[%s1161_s1 + $0x68] sm:$0xff] %v486_v52  ;;  %489 = vst [vmem:[%s1161_s1 + $0x1e8] sm:$0xff] %v488_v53  ;;  %v492_v55 = vld [vmem:[%s1160_s0 + $0x238] sm:$0xff]  ;;  %v494_v56 = vld [vmem:[%s1160_s0 + $0xe8] sm:$0xff] }
  0x1d   :  { %491 = vst [vmem:[%s1161_s1 + $0x98] sm:$0xff] %v490_v54  ;;  %493 = vst [vmem:[%s1161_s1 + $0x218] sm:$0xff] %v492_v55  ;;  %v496_v57 = vld [vmem:[%s1160_s0 + $0x268] sm:$0xff]  ;;  %v498_v58 = vld [vmem:[%s1160_s0 + $0x118] sm:$0xff] }
  0x1e   :  { %495 = vst [vmem:[%s1161_s1 + $0xc8] sm:$0xff] %v494_v56  ;;  %v500_v59 = vld [vmem:[%s1160_s0 + $0x298] sm:$0xff]  ;;  %497 = vst [vmem:[%s1161_s1 + $0x248] sm:$0xff] %v496_v57  ;;  %v502_v60 = vld [vmem:[%s1160_s0 + $0x148] sm:$0xff] }
  0x1f   :  { %499 = vst [vmem:[%s1161_s1 + $0xf8] sm:$0xff] %v498_v58  ;;  %501 = vst [vmem:[%s1161_s1 + $0x278] sm:$0xff] %v500_v59  ;;  %v504_v61 = vld [vmem:[%s1160_s0 + $0x2c8] sm:$0xff]  ;;  %v506_v62 = vld [vmem:[%s1160_s0 + $0x178] sm:$0xff] }
  0x20   :  { %503 = vst [vmem:[%s1161_s1 + $0x128] sm:$0xff] %v502_v60  ;;  %505 = vst [vmem:[%s1161_s1 + $0x2a8] sm:$0xff] %v504_v61  ;;  %v508_v63 = vld [vmem:[%s1160_s0 + $0x2f8] sm:$0xff]  ;;  %v514_v2 = vld [vmem:[%s1160_s0 + $0x48] sm:$0xff] }
  0x21   :  { %507 = vst [vmem:[%s1161_s1 + $0x158] sm:$0xff] %v506_v62  ;;  %v510_v0 = vld [vmem:[%s1160_s0 + $0x18] sm:$0xff]  ;;  %509 = vst [vmem:[%s1161_s1 + $0x2d8] sm:$0xff] %v508_v63  ;;  %v516_v3 = vld [vmem:[%s1160_s0 + $0x1c8] sm:$0xff] }
  0x22   :  { %v512_v1 = vld [vmem:[%s1160_s0 + $0x198] sm:$0xff]  ;;  %511 = vst [vmem:[%s1161_s1 + $0x18] sm:$0xff] %v510_v0  ;;  %515 = vst [vmem:[%s1161_s1 + $0x48] sm:$0xff] %v514_v2  ;;  %v522_v6 = vld [vmem:[%s1160_s0 + $0xa8] sm:$0xff] }
  0x23   :  { %513 = vst [vmem:[%s1161_s1 + $0x198] sm:$0xff] %v512_v1  ;;  %v518_v4 = vld [vmem:[%s1160_s0 + $0x78] sm:$0xff]  ;;  %517 = vst [vmem:[%s1161_s1 + $0x1c8] sm:$0xff] %v516_v3  ;;  %v524_v7 = vld [vmem:[%s1160_s0 + $0x228] sm:$0xff] }
  0x24   :  { %519 = vst [vmem:[%s1161_s1 + $0x78] sm:$0xff] %v518_v4  ;;  %v520_v5 = vld [vmem:[%s1160_s0 + $0x1f8] sm:$0xff]  ;;  %523 = vst [vmem:[%s1161_s1 + $0xa8] sm:$0xff] %v522_v6  ;;  %v530_v10 = vld [vmem:[%s1160_s0 + $0x108] sm:$0xff] }
  0x25   :  { %521 = vst [vmem:[%s1161_s1 + $0x1f8] sm:$0xff] %v520_v5  ;;  %525 = vst [vmem:[%s1161_s1 + $0x228] sm:$0xff] %v524_v7  ;;  %v526_v8 = vld [vmem:[%s1160_s0 + $0xd8] sm:$0xff]  ;;  %v532_v11 = vld [vmem:[%s1160_s0 + $0x288] sm:$0xff] }
  0x26   :  { %v528_v9 = vld [vmem:[%s1160_s0 + $0x258] sm:$0xff]  ;;  %527 = vst [vmem:[%s1161_s1 + $0xd8] sm:$0xff] %v526_v8  ;;  %531 = vst [vmem:[%s1161_s1 + $0x108] sm:$0xff] %v530_v10  ;;  %v538_v14 = vld [vmem:[%s1160_s0 + $0x168] sm:$0xff] }
  0x27   :  { %529 = vst [vmem:[%s1161_s1 + $0x258] sm:$0xff] %v528_v9  ;;  %v534_v12 = vld [vmem:[%s1160_s0 + $0x138] sm:$0xff]  ;;  %533 = vst [vmem:[%s1161_s1 + $0x288] sm:$0xff] %v532_v11  ;;  %v540_v15 = vld [vmem:[%s1160_s0 + $0x2e8] sm:$0xff] }
  0x28   :  { %v536_v13 = vld [vmem:[%s1160_s0 + $0x2b8] sm:$0xff]  ;;  %535 = vst [vmem:[%s1161_s1 + $0x138] sm:$0xff] %v534_v12  ;;  %v542_v16 = vld [vmem:[%s1160_s0 + $0x8] sm:$0xff]  ;;  %539 = vst [vmem:[%s1161_s1 + $0x168] sm:$0xff] %v538_v14 }
  0x29   :  { %537 = vst [vmem:[%s1161_s1 + $0x2b8] sm:$0xff] %v536_v13  ;;  %541 = vst [vmem:[%s1161_s1 + $0x2e8] sm:$0xff] %v540_v15  ;;  %v544_v17 = vld [vmem:[%s1160_s0 + $0x188] sm:$0xff]  ;;  %v546_v18 = vld [vmem:[%s1160_s0 + $0x38] sm:$0xff] }
  0x2a   :  { %543 = vst [vmem:[%s1161_s1 + $0x28] sm:$0xff] %v542_v16  ;;  %v548_v19 = vld [vmem:[%s1160_s0 + $0x1b8] sm:$0xff]  ;;  %545 = vst [vmem:[%s1161_s1 + $0x1a8] sm:$0xff] %v544_v17  ;;  %v550_v20 = vld [vmem:[%s1160_s0 + $0x68] sm:$0xff] }
  0x2b   :  { %547 = vst [vmem:[%s1161_s1 + $0x58] sm:$0xff] %v546_v18  ;;  %549 = vst [vmem:[%s1161_s1 + $0x1d8] sm:$0xff] %v548_v19  ;;  %v552_v21 = vld [vmem:[%s1160_s0 + $0x1e8] sm:$0xff]  ;;  %v554_v22 = vld [vmem:[%s1160_s0 + $0x98] sm:$0xff] }
  0x2c   :  { %551 = vst [vmem:[%s1161_s1 + $0x88] sm:$0xff] %v550_v20  ;;  %553 = vst [vmem:[%s1161_s1 + $0x208] sm:$0xff] %v552_v21  ;;  %v556_v23 = vld [vmem:[%s1160_s0 + $0x218] sm:$0xff]  ;;  %v558_v24 = vld [vmem:[%s1160_s0 + $0xc8] sm:$0xff] }
  0x2d   :  { %555 = vst [vmem:[%s1161_s1 + $0xb8] sm:$0xff] %v554_v22  ;;  %v560_v25 = vld [vmem:[%s1160_s0 + $0x248] sm:$0xff]  ;;  %557 = vst [vmem:[%s1161_s1 + $0x238] sm:$0xff] %v556_v23  ;;  %v562_v26 = vld [vmem:[%s1160_s0 + $0xf8] sm:$0xff] }
  0x2e   :  { %559 = vst [vmem:[%s1161_s1 + $0xe8] sm:$0xff] %v558_v24  ;;  %561 = vst [vmem:[%s1161_s1 + $0x268] sm:$0xff] %v560_v25  ;;  %v564_v27 = vld [vmem:[%s1160_s0 + $0x278] sm:$0xff]  ;;  %v566_v28 = vld [vmem:[%s1160_s0 + $0x128] sm:$0xff] }
  0x2f   :  { %563 = vst [vmem:[%s1161_s1 + $0x118] sm:$0xff] %v562_v26  ;;  %565 = vst [vmem:[%s1161_s1 + $0x298] sm:$0xff] %v564_v27  ;;  %v568_v29 = vld [vmem:[%s1160_s0 + $0x2a8] sm:$0xff]  ;;  %v570_v30 = vld [vmem:[%s1160_s0 + $0x158] sm:$0xff] }
  0x30   :  { %567 = vst [vmem:[%s1161_s1 + $0x148] sm:$0xff] %v566_v28  ;;  %v572_v31 = vld [vmem:[%s1160_s0 + $0x2d8] sm:$0xff]  ;;  %569 = vst [vmem:[%s1161_s1 + $0x2c8] sm:$0xff] %v568_v29 }
  0x31   :  { %571 = vst [vmem:[%s1161_s1 + $0x178] sm:$0xff] %v570_v30  ;;  %573 = vst [vmem:[%s1161_s1 + $0x2f8] sm:$0xff] %v572_v31 }

</bundles_post_ra>
